<compile_context>
chip_gen: v7x
topology: tpu7x:2x2x1
jax: 0.10.0
libtpu: 0.0.40
codegen_flags: <defaults>
</compile_context>

<pallas_src>
import jax
import jax.numpy as jnp
from jax.experimental import pallas as pl
from jax.experimental.pallas import tpu as pltpu

BN_EPS = 1e-5


# --------------------------------------------------------------------------- kernel

def _phase_body(x_ref, w1_ref, p_ref, w2_ref, b2_ref, o_ref, h_acc, h_act, *, kt):
    i = pl.program_id(0)

    # ---- phase 1 (steps [0, kt)): accumulate h = x @ w1, b1 folded into the init ----
    @pl.when(i < kt)
    def _():
        @pl.when(i == 0)
        def _():
            # init accumulator with b1 broadcast (hoisted out of the per-step path)
            h_acc[...] = jnp.broadcast_to(p_ref[0:1, :], h_acc.shape)

        h_acc[...] += jnp.dot(x_ref[...], w1_ref[...],
                              preferred_element_type=jnp.float32)

        # Last K step: BatchNorm with *global* batch stats (fused affine) + ReLU.
        @pl.when(i == kt - 1)
        def _():
            h = h_acc[...]
            mean = jnp.mean(h, axis=0, keepdims=True)
            var = jnp.mean(jnp.square(h - mean), axis=0, keepdims=True)
            scale = p_ref[1:2, :] * jax.lax.rsqrt(var + BN_EPS)   # gamma * rsqrt(var+eps)
            shift = p_ref[2:3, :] - mean * scale                  # beta  - mean * scale
            h_act[...] = jnp.maximum(h * scale + shift, 0.0).astype(h_act.dtype)

    # ---- phase 2 (steps [kt, kt+nt)): out block n = h_act @ w2[:, n] + b2[:, n] ----
    @pl.when(i >= kt)
    def _():
        out = jnp.dot(h_act[...], w2_ref[...],
                      preferred_element_type=jnp.float32) + b2_ref[...]
        o_ref[...] = out.astype(o_ref.dtype)


def _make_kernel(kt, separate_act):
    if separate_act:
        def kernel(x_ref, w1_ref, p_ref, w2_ref, b2_ref, o_ref, h_acc, h_act):
            _phase_body(x_ref, w1_ref, p_ref, w2_ref, b2_ref, o_ref, h_acc, h_act, kt=kt)
    else:
        # f32 matmul path: BN/ReLU result reuses the accumulator (saves a (B, hidden) scratch).
        def kernel(x_ref, w1_ref, p_ref, w2_ref, b2_ref, o_ref, h_acc):
            _phase_body(x_ref, w1_ref, p_ref, w2_ref, b2_ref, o_ref, h_acc, h_acc, kt=kt)
    return kernel


# --------------------------------------------------------------------------- tiling helpers

def _padded_bytes(shape, dtype):
    """Conservative VMEM tile footprint (pad last two dims to (8, 128))."""
    r = shape[-2] if len(shape) > 1 else 1
    c = shape[-1]
    rp = -(-r // 8) * 8
    cp = -(-c // 128) * 128
    return rp * cp * jnp.dtype(dtype).itemsize


def _tile_candidates(dim):
    """Valid tile sizes for `dim` (multiples of 128 that divide it, else `dim`), descending."""
    if dim % 128 != 0:
        return [dim]
    return sorted({t for t in range(128, dim + 1, 128) if dim % t == 0}, reverse=True)


def _pick_tk(in_dim, desired):
    cands = _tile_candidates(in_dim)
    for t in cands:                       # largest tile <= desired that still leaves kt >= 2
        if t <= desired and in_dim // t >= 2:
            return t
    for t in cands:                       # else largest tile <= desired
        if t <= desired:
            return t
    return cands[-1]


def _pick_tn(out_dim, desired):
    cands = _tile_candidates(out_dim)
    for t in cands:
        if t <= desired:
            return t
    return cands[-1]


def _next_smaller(dim, current):
    for t in _tile_candidates(dim):
        if t < current:
            return t
    return None


def _footprint_bytes(B, hidden, tk, tn, nt, mm_dtype, out_dtype, separate_act):
    w2_buf = 3 if nt >= 2 else 2
    blocks = (2 * _padded_bytes((B, tk), mm_dtype)
              + 2 * _padded_bytes((tk, hidden), mm_dtype)
              + 2 * _padded_bytes((3, hidden), jnp.float32)
              + w2_buf * _padded_bytes((hidden, tn), mm_dtype)
              + w2_buf * _padded_bytes((1, tn), jnp.float32)
              + 2 * _padded_bytes((B, tn), out_dtype))
    scratch = _padded_bytes((B, hidden), jnp.float32)
    if separate_act:
        scratch += _padded_bytes((B, hidden), mm_dtype)
    return blocks + scratch


def _spec(shape, index_map, buffers=2):
    """BlockSpec with optional deeper pipelining; falls back cleanly on older APIs."""
    if buffers != 2 and hasattr(pl, "Buffered"):
        try:
            return pl.BlockSpec(shape, index_map, pipeline_mode=pl.Buffered(buffers))
        except TypeError:
            pass
    return pl.BlockSpec(shape, index_map)


# --------------------------------------------------------------------------- wrapper

def prediction_mlp(x, w1, b1, gamma, beta, w2, b2, *, block_k=None, block_n=None):
    """Fused Linear -> BatchNorm1d(training stats) -> ReLU -> Linear.

    x: (B, in_dim). w1: (in_dim, hidden). w2: (hidden, out_dim).
    b1/gamma/beta: (1, hidden) (or (hidden,)). b2: (1, out_dim) (or (out_dim,)).

    Matmul dtype follows the WEIGHT dtype: keep weights bf16 at rest (cast once, outside
    the hot path) for the 2x HBM-traffic win; BN/ReLU always run in f32.
    """
    B, in_dim = x.shape
    hidden = w1.shape[1]
    out_dim = w2.shape[1]
    assert w1.shape == (in_dim, hidden) and w2.shape == (hidden, out_dim)
    assert w1.dtype == w2.dtype, "w1/w2 must share a dtype (cast once, outside the hot path)"

    out_dtype = x.dtype
    mm_dtype = w1.dtype
    x_in = x if x.dtype == mm_dtype else x.astype(mm_dtype)     # activations only, not weights
    separate_act = (jnp.dtype(mm_dtype) != jnp.dtype(jnp.float32))

    # ---- tile selection: big tiles, auto-shrunk to the generation's VMEM budget ----
    tk = _pick_tk(in_dim, block_k or 2048)
    tn = _pick_tn(out_dim, block_n or out_dim)

    try:
        cap_bytes = int(pltpu.get_tpu_info().vmem_capacity_bytes)   # 128 MiB v5e/v6e, 64 MiB v7x/TC
    except Exception:
        cap_bytes = 64 << 20                                        # conservative fallback
    cap_bytes = max(min(cap_bytes, 128 << 20), 32 << 20)
    budget = int(0.70 * cap_bytes)       # headroom for Mosaic internal scratch

    def fp(tk_, tn_):
        return _footprint_bytes(B, hidden, tk_, tn_, out_dim // tn_,
                                mm_dtype, out_dtype, separate_act)

    while fp(tk, tn) > budget:
        tk_bytes = 2 * (_padded_bytes((B, tk), mm_dtype) + _padded_bytes((tk, hidden), mm_dtype))
        tn_bytes = (3 * _padded_bytes((hidden, tn), mm_dtype)
                    + 2 * _padded_bytes((B, tn), out_dtype))
        new_tk = _next_smaller(in_dim, tk)
        new_tn = _next_smaller(out_dim, tn)
        if tn_bytes >= tk_bytes and new_tn is not None:
            tn = new_tn
        elif new_tk is not None:
            tk = new_tk
        elif new_tn is not None:
            tn = new_tn
        else:
            break   # TODO(synk): cannot shrink further (very large B*hidden); rely on vmem clamp

    kt = in_dim // tk
    nt = out_dim // tn
    last_k = kt - 1
    w2_buffers = 3 if nt >= 2 else 2     # 3-deep hides the next w2 column DMA behind the BN step

    # Pack b1/gamma/beta into ONE (3, hidden) f32 tile -> single tiny DMA.
    params = jnp.concatenate(
        [jnp.reshape(b1, (1, hidden)).astype(jnp.float32),
         jnp.reshape(gamma, (1, hidden)).astype(jnp.float32),
         jnp.reshape(beta, (1, hidden)).astype(jnp.float32)], axis=0)
    b2_row = jnp.reshape(b2, (1, out_dim)).astype(jnp.float32)

    # Index maps over the flattened (K-phase ++ N-phase) grid.  The output block index
    # stays 0 throughout phase 1 and only advances in phase 2, so each (B, tn) output
    # tile is written back to HBM exactly once.
    x_spec = pl.BlockSpec((B, tk), lambda i: (0, jnp.minimum(i, last_k)))
    w1_spec = pl.BlockSpec((tk, hidden), lambda i: (jnp.minimum(i, last_k), 0))
    p_spec = pl.BlockSpec((3, hidden), lambda i: (0, 0))
    w2_spec = _spec((hidden, tn), lambda i: (0, jnp.maximum(i - kt, 0)), buffers=w2_buffers)
    b2_spec = _spec((1, tn), lambda i: (0, jnp.maximum(i - kt, 0)), buffers=w2_buffers)
    out_spec = pl.BlockSpec((B, tn), lambda i: (0, jnp.maximum(i - kt, 0)))

    scratch_shapes = [pltpu.VMEM((B, hidden), jnp.float32)]       # h accumulator (f32 BN input)
    if separate_act:
        scratch_shapes.append(pltpu.VMEM((B, hidden), mm_dtype))  # bf16 activated h for matmul 2

    footprint = fp(tk, tn)
    vmem_limit = int(min(max(footprint + (4 << 20), 16 << 20), int(0.9 * cap_bytes)))

    return pl.pallas_call(
        _make_kernel(kt, separate_act),
        out_shape=jax.ShapeDtypeStruct((B, out_dim), out_dtype),
        grid=(kt + nt,),
        in_specs=[x_spec, w1_spec, p_spec, w2_spec, b2_spec],
        out_specs=out_spec,
        scratch_shapes=scratch_shapes,
        compiler_params=pltpu.CompilerParams(
            dimension_semantics=("arbitrary",),
            vmem_limit_bytes=vmem_limit,
        ),
    )(x_in, w1, params, w2, b2_row)


# --------------------------------------------------------------------------- reference

def reference(x, w1, b1, gamma, beta, w2, b2):
    h = x @ w1 + b1
    mean = jnp.mean(h, axis=0, keepdims=True)
    var = jnp.mean((h - mean) ** 2, axis=0, keepdims=True)
    h = (h - mean) * jax.lax.rsqrt(var + BN_EPS) * gamma + beta
    h = jnp.maximum(h, 0.0)
    return h @ w2 + b2


if __name__ == "__main__":
    key = jax.random.PRNGKey(0)
    kx, kw1, kb1, kg, kbt, kw2, kb2 = jax.random.split(key, 7)

    # Small shapes consistent with the module (in_dim -> hidden -> out_dim), 128-lane aligned.
    B, IN_DIM, HIDDEN, OUT_DIM = 8, 512, 128, 512

    x = jax.random.normal(kx, (B, IN_DIM), dtype=jnp.float32)
    w1 = jax.random.normal(kw1, (IN_DIM, HIDDEN), dtype=jnp.float32) * (1.0 / IN_DIM ** 0.5)
    b1 = 0.1 * jax.random.normal(kb1, (1, HIDDEN), dtype=jnp.float32)
    gamma = 1.0 + 0.1 * jax.random.normal(kg, (1, HIDDEN), dtype=jnp.float32)
    beta = 0.1 * jax.random.normal(kbt, (1, HIDDEN), dtype=jnp.float32)
    w2 = jax.random.normal(kw2, (HIDDEN, OUT_DIM), dtype=jnp.float32) * (1.0 / HIDDEN ** 0.5)
    b2 = 0.1 * jax.random.normal(kb2, (1, OUT_DIM), dtype=jnp.float32)

    ref = reference(x, w1, b1, gamma, beta, w2, b2)

    # 1) f32 path, auto tiles (kt=2 K-steps, single full-width N block).
    out = prediction_mlp(x, w1, b1, gamma, beta, w2, b2)
    jax.block_until_ready(out)
    assert out.shape == (B, OUT_DIM)
    assert jnp.allclose(out, ref, atol=2e-4, rtol=2e-4), "f32 auto-tiled kernel mismatch"

    # 2) f32 path, forced small tiles (kt=4, nt=4 -> both pipelined phases + Buffered(3) w2).
    out_small = prediction_mlp(x, w1, b1, gamma, beta, w2, b2, block_k=128, block_n=128)
    jax.block_until_ready(out_small)
    assert jnp.allclose(out_small, ref, atol=2e-4, rtol=2e-4), "f32 small-tile kernel mismatch"

    # 3) Degenerate single-K-block path (kt == 1: init, accumulate and BN all on step 0).
    x2 = jax.random.normal(kx, (B, 128), dtype=jnp.float32)
    w1s = jax.random.normal(kw1, (128, HIDDEN), dtype=jnp.float32) * (1.0 / 128 ** 0.5)
    ref2 = reference(x2, w1s, b1, gamma, beta, w2, b2)
    out2 = prediction_mlp(x2, w1s, b1, gamma, beta, w2, b2)
    jax.block_until_ready(out2)
    assert jnp.allclose(out2, ref2, atol=2e-4, rtol=2e-4), "kt==1 kernel mismatch"

    # 4) bf16-weight path: weights cast ONCE outside the hot path (bf16 at rest);
    #    matmuls run bf16 with f32 accumulation, BN/ReLU stay f32 -> BN stats can drift
    #    slightly from the pure-f32 reference (intentional; loose tolerance).
    w1_bf, w2_bf = w1.astype(jnp.bfloat16), w2.astype(jnp.bfloat16)
    out_bf = prediction_mlp(x, w1_bf, b1, gamma, beta, w2_bf, b2, block_k=128, block_n=128)
    jax.block_until_ready(out_bf)
    assert out_bf.shape == (B, OUT_DIM) and out_bf.dtype == x.dtype
    assert bool(jnp.max(jnp.abs(out_bf - ref)) < 0.5), "bf16 weight path diverged"

    print("KERNEL_OK")
</pallas_src>

<mosaic_0001>
module attributes {stable_mosaic.version = 11 : i64} {
  func.func @kernel(%arg0: i32, %arg1: memref<8x256xf32, #tpu.memory_space<vmem>>, %arg2: memref<256x128xf32, #tpu.memory_space<vmem>>, %arg3: memref<3x128xf32, #tpu.memory_space<vmem>>, %arg4: memref<128x512xf32, #tpu.memory_space<vmem>>, %arg5: memref<1x512xf32, #tpu.memory_space<vmem>>, %arg6: memref<8x512xf32, #tpu.memory_space<vmem>>, %arg7: memref<8x128xf32, #tpu.memory_space<vmem>>) attributes {dimension_semantics = [#tpu.dimension_semantics<arbitrary>], iteration_bounds = array<i64: 3>, scalar_prefetch = 0 : i64, scratch_operands = 1 : i64, tpu.core_type = #tpu.core_type<tc>, window_params = [{transform_indices = @transform_0, window_bounds = array<i64: 8, 256>}, {transform_indices = @transform_1, window_bounds = array<i64: 256, 128>}, {pipeline_mode = #tpu.pipeline_mode<synchronous>, transform_indices = @transform_2, window_bounds = array<i64: 3, 128>}, {transform_indices = @transform_3, window_bounds = array<i64: 128, 512>}, {transform_indices = @transform_4, window_bounds = array<i64: 1, 512>}, {transform_indices = @transform_5, window_bounds = array<i64: 8, 512>}]} {
    %c2_i32 = arith.constant 2 : i32
    %0 = arith.cmpi slt, %arg0, %c2_i32 : i32
    %1 = arith.extui %0 : i1 to i32
    %c0_i32 = arith.constant 0 : i32
    %2 = arith.cmpi ne, %1, %c0_i32 : i32
    scf.if %2 {
      %c0_i32_2 = arith.constant 0 : i32
      %6 = arith.cmpi eq, %arg0, %c0_i32_2 : i32
      %7 = arith.extui %6 : i1 to i32
      %c0_i32_3 = arith.constant 0 : i32
      %8 = arith.cmpi ne, %7, %c0_i32_3 : i32
      scf.if %8 {
        %c0_12 = arith.constant 0 : index
        %c0_13 = arith.constant 0 : index
        %18 = vector.load %arg3[%c0_12, %c0_13] : memref<3x128xf32, #tpu.memory_space<vmem>>, vector<1x128xf32>
        %19 = vector.shape_cast %18 : vector<1x128xf32> to vector<1x128xf32>
        %20 = vector.broadcast %19 : vector<1x128xf32> to vector<8x128xf32>
        %c0_14 = arith.constant 0 : index
        %c0_15 = arith.constant 0 : index
        %21 = vector.load %arg7[%c0_14, %c0_15] : memref<8x128xf32, #tpu.memory_space<vmem>>, vector<8x128xf32>
        tpu.vector_store %arg7[%c0_14, %c0_15], %20 {strides = array<i32>} : memref<8x128xf32, #tpu.memory_space<vmem>>, vector<8x128xf32>,
      } else {
      }
      %c0 = arith.constant 0 : index
      %c0_4 = arith.constant 0 : index
      %9 = vector.load %arg7[%c0, %c0_4] : memref<8x128xf32, #tpu.memory_space<vmem>>, vector<8x128xf32>
      %c0_5 = arith.constant 0 : index
      %c0_6 = arith.constant 0 : index
      %10 = vector.load %arg1[%c0_5, %c0_6] : memref<8x256xf32, #tpu.memory_space<vmem>>, vector<8x256xf32>
      %c0_7 = arith.constant 0 : index
      %c0_8 = arith.constant 0 : index
      %11 = vector.load %arg2[%c0_7, %c0_8] : memref<256x128xf32, #tpu.memory_space<vmem>>, vector<256x128xf32>
      %cst = arith.constant dense<0.000000e+00> : vector<8x128xf32>
      %12 = tpu.matmul %10, %11, %cst {dimension_numbers = #tpu.dot_dimension_numbers<[1], [0], [0], [1], [0, 0, 1, 1], [], []>} : vector<8x256xf32>, vector<256x128xf32>, vector<8x128xf32> -> vector<8x128xf32>
      %13 = arith.addf %9, %12 : vector<8x128xf32>
      %c0_9 = arith.constant 0 : index
      %c0_10 = arith.constant 0 : index
      %14 = vector.load %arg7[%c0_9, %c0_10] : memref<8x128xf32, #tpu.memory_space<vmem>>, vector<8x128xf32>
      tpu.vector_store %arg7[%c0_9, %c0_10], %13 {strides = array<i32>} : memref<8x128xf32, #tpu.memory_space<vmem>>, vector<8x128xf32>,
      %c1_i32 = arith.constant 1 : i32
      %15 = arith.cmpi eq, %arg0, %c1_i32 : i32
      %16 = arith.extui %15 : i1 to i32
      %c0_i32_11 = arith.constant 0 : i32
      %17 = arith.cmpi ne, %16, %c0_i32_11 : i32
      scf.if %17 {
        %c0_12 = arith.constant 0 : index
        %c0_13 = arith.constant 0 : index
        %18 = vector.load %arg7[%c0_12, %c0_13] : memref<8x128xf32, #tpu.memory_space<vmem>>, vector<8x128xf32>
        %cst_14 = arith.constant dense<0.000000e+00> : vector<128xf32>
        %19 = vector.multi_reduction <add>, %18, %cst_14 [0] : vector<8x128xf32> to vector<128xf32>
        %20 = vector.shape_cast %19 : vector<128xf32> to vector<1x128xf32>
        %cst_15 = arith.constant 8.000000e+00 : f32
        %21 = vector.broadcast %cst_15 : f32 to vector<1x128xf32>
        %22 = arith.divf %20, %21 : vector<1x128xf32>
        %23 = vector.broadcast %22 : vector<1x128xf32> to vector<8x128xf32>
        %24 = arith.subf %18, %23 : vector<8x128xf32>
        %25 = arith.mulf %24, %24 : vector<8x128xf32>
        %cst_16 = arith.constant dense<0.000000e+00> : vector<128xf32>
        %26 = vector.multi_reduction <add>, %25, %cst_16 [0] : vector<8x128xf32> to vector<128xf32>
        %27 = vector.shape_cast %26 : vector<128xf32> to vector<1x128xf32>
        %cst_17 = arith.constant 8.000000e+00 : f32
        %28 = vector.broadcast %cst_17 : f32 to vector<1x128xf32>
        %29 = arith.divf %27, %28 : vector<1x128xf32>
        %c1 = arith.constant 1 : index
        %c0_18 = arith.constant 0 : index
        %30 = vector.load %arg3[%c1, %c0_18] : memref<3x128xf32, #tpu.memory_space<vmem>>, vector<1x128xf32>
        %cst_19 = arith.constant 9.99999974E-6 : f32
        %31 = vector.broadcast %cst_19 : f32 to vector<1x128xf32>
        %32 = arith.addf %29, %31 : vector<1x128xf32>
        %33 = math.rsqrt %32 : vector<1x128xf32>
        %34 = arith.mulf %30, %33 : vector<1x128xf32>
        %c2 = arith.constant 2 : index
        %c0_20 = arith.constant 0 : index
        %35 = vector.load %arg3[%c2, %c0_20] : memref<3x128xf32, #tpu.memory_space<vmem>>, vector<1x128xf32>
        %36 = arith.mulf %22, %34 : vector<1x128xf32>
        %37 = arith.subf %35, %36 : vector<1x128xf32>
        %38 = vector.broadcast %34 : vector<1x128xf32> to vector<8x128xf32>
        %39 = arith.mulf %18, %38 : vector<8x128xf32>
        %40 = vector.broadcast %37 : vector<1x128xf32> to vector<8x128xf32>
        %41 = arith.addf %39, %40 : vector<8x128xf32>
        %cst_21 = arith.constant 0.000000e+00 : f32
        %42 = vector.broadcast %cst_21 : f32 to vector<8x128xf32>
        %43 = arith.maximumf %41, %42 : vector<8x128xf32>
        %c0_22 = arith.constant 0 : index
        %c0_23 = arith.constant 0 : index
        %44 = vector.load %arg7[%c0_22, %c0_23] : memref<8x128xf32, #tpu.memory_space<vmem>>, vector<8x128xf32>
        tpu.vector_store %arg7[%c0_22, %c0_23], %43 {strides = array<i32>} : memref<8x128xf32, #tpu.memory_space<vmem>>, vector<8x128xf32>,
      } else {
      }
    } else {
    }
    %c2_i32_0 = arith.constant 2 : i32
    %3 = arith.cmpi sge, %arg0, %c2_i32_0 : i32
    %4 = arith.extui %3 : i1 to i32
    %c0_i32_1 = arith.constant 0 : i32
    %5 = arith.cmpi ne, %4, %c0_i32_1 : i32
    scf.if %5 {
      %c0 = arith.constant 0 : index
      %c0_2 = arith.constant 0 : index
      %6 = vector.load %arg7[%c0, %c0_2] : memref<8x128xf32, #tpu.memory_space<vmem>>, vector<8x128xf32>
      %c0_3 = arith.constant 0 : index
      %c0_4 = arith.constant 0 : index
      %7 = vector.load %arg4[%c0_3, %c0_4] : memref<128x512xf32, #tpu.memory_space<vmem>>, vector<128x512xf32>
      %cst = arith.constant dense<0.000000e+00> : vector<8x512xf32>
      %8 = tpu.matmul %6, %7, %cst {dimension_numbers = #tpu.dot_dimension_numbers<[1], [0], [0], [1], [0, 0, 1, 1], [], []>} : vector<8x128xf32>, vector<128x512xf32>, vector<8x512xf32> -> vector<8x512xf32>
      %c0_5 = arith.constant 0 : index
      %c0_6 = arith.constant 0 : index
      %9 = vector.load %arg5[%c0_5, %c0_6] : memref<1x512xf32, #tpu.memory_space<vmem>>, vector<1x512xf32>
      %10 = vector.broadcast %9 : vector<1x512xf32> to vector<8x512xf32>
      %11 = arith.addf %8, %10 : vector<8x512xf32>
      %c0_7 = arith.constant 0 : index
      %c0_8 = arith.constant 0 : index
      %12 = vector.load %arg6[%c0_7, %c0_8] : memref<8x512xf32, #tpu.memory_space<vmem>>, vector<8x512xf32>
      tpu.vector_store %arg6[%c0_7, %c0_8], %11 {strides = array<i32>} : memref<8x512xf32, #tpu.memory_space<vmem>>, vector<8x512xf32>,
    } else {
    }
    return
  }
  func.func @transform_0(%arg0: i32) -> (i32, i32) {
    %c1_i32 = arith.constant 1 : i32
    %0 = arith.minsi %arg0, %c1_i32 : i32
    %c0_i32 = arith.constant 0 : i32
    %c0_i32_0 = arith.constant 0 : i32
    return %c0_i32, %0 : i32, i32
  }
  func.func @transform_1(%arg0: i32) -> (i32, i32) {
    %c1_i32 = arith.constant 1 : i32
    %0 = arith.minsi %arg0, %c1_i32 : i32
    %c0_i32 = arith.constant 0 : i32
    %c0_i32_0 = arith.constant 0 : i32
    return %0, %c0_i32 : i32, i32
  }
  func.func @transform_2(%arg0: i32) -> (i32, i32) {
    %c0_i32 = arith.constant 0 : i32
    %c0_i32_0 = arith.constant 0 : i32
    %c0_i32_1 = arith.constant 0 : i32
    return %c0_i32, %c0_i32_0 : i32, i32
  }
  func.func @transform_3(%arg0: i32) -> (i32, i32) {
    %c2_i32 = arith.constant 2 : i32
    %0 = arith.subi %arg0, %c2_i32 : i32
    %c0_i32 = arith.constant 0 : i32
    %1 = arith.maxsi %0, %c0_i32 : i32
    %c0_i32_0 = arith.constant 0 : i32
    %c0_i32_1 = arith.constant 0 : i32
    return %c0_i32_0, %1 : i32, i32
  }
  func.func @transform_4(%arg0: i32) -> (i32, i32) {
    %c2_i32 = arith.constant 2 : i32
    %0 = arith.subi %arg0, %c2_i32 : i32
    %c0_i32 = arith.constant 0 : i32
    %1 = arith.maxsi %0, %c0_i32 : i32
    %c0_i32_0 = arith.constant 0 : i32
    %c0_i32_1 = arith.constant 0 : i32
    return %c0_i32_0, %1 : i32, i32
  }
  func.func @transform_5(%arg0: i32) -> (i32, i32) {
    %c2_i32 = arith.constant 2 : i32
    %0 = arith.subi %arg0, %c2_i32 : i32
    %c0_i32 = arith.constant 0 : i32
    %1 = arith.maxsi %0, %c0_i32 : i32
    %c0_i32_0 = arith.constant 0 : i32
    %c0_i32_1 = arith.constant 0 : i32
    return %c0_i32_0, %1 : i32, i32
  }
}

</mosaic_0001>

<bundles_post_ra>
// kernel: tpu_custom_call.1
= control target key start
LH: loop header
LB: loop body
LE: loop exit
PB: predicated region body
PF: predicated region fallthrough
CT: control target
= control target key end

     0   :  { %s1853_s0 = inlined_call_operand.hbm [shape: f32[8,512], index: 0, kind: input, shape index: {}]   ;;  %s1854_s1 = inlined_call_operand.hbm [shape: f32[512,128], index: 1, kind: input, shape index: {}]   ;;  %s1855_s2 = inlined_call_operand.vmem [shape: f32[3,128], index: 2, kind: input, shape index: {}]   ;;  %s1856_s3 = inlined_call_operand.hbm [shape: f32[128,512], index: 3, kind: input, shape index: {}]   ;;  %s1857_s4 = inlined_call_operand.vmem [shape: f32[1,512], index: 4, kind: input, shape index: {}]   ;;  %s1858_s5 = inlined_call_operand.hbm [shape: f32[8,512], index: 5, kind: output, shape index: {}]  }
   0x1   :  { %1864 = sst [smem:[#allocation14_spill]] %s1853_s0 }
   0x2   :  { %1865 = sst [smem:[#allocation15_spill]] %s1854_s1 }
   0x3   :  { %10 = vsyncpa [#allocation4], 0 }
   0x4   :  { %12 = vsyncpa [#allocation4 + $0x1], 0 }
   0x5   :  { %13 = vsyncpa [#allocation7], 0 }
   0x6   :  { %15 = vsyncpa [#allocation7 + $0x1], 0 }
   0x7   :  { %16 = vsyncpa [#allocation5], 0 }
   0x8   :  { %18 = vsyncpa [#allocation5 + $0x1], 0  ;;  %s1426_s18 = smov 0   ;;  %s1428_s19 = smov 0  }
   0x9   :  { %s1430_s20 = smov 0   ;;  %s1432_s21 = smov 0  }
   0xa   :  { %s1434_s22 = smov 0   ;;  %s1436_s23 = smov 0  }
   0xb   :  { %s1438_s24 = smov 0  }
   0xc LB: > { %s1460_s25 = sadd.s32 4294967295, %s1385_s24   ;;  %s1463_s26 = sadd.s32 1, %s1385_s24   ;;  %s1385_s24 = sphi %s1438_s24, %s1889_s24   ;;  %s1381_s23 = sphi %s1436_s23, %s1888_s23   ;;  %s1377_s22 = sphi %s1434_s22, %s1887_s22   ;;  %s1373_s21 = sphi %s1432_s21, %s1886_s21   ;;  %s1369_s20 = sphi %s1430_s20, %s1885_s20   ;;  %s1365_s19 = sphi %s1428_s19, %s1884_s19   ;;  %s1361_s18 = sphi %s1426_s18, %s1883_s18  }
   0xd   : > { %p28_p0 = scmp.lt.s32.totalorder %s1385_s24, 1  ;;  %p30_p1 = scmp.lt.s32.totalorder %s1463_s26, 1 }
   0xe   : > { %s35_s27 = sadd.s32 1, %s1381_s23  ;;  %p42_p2 = scmp.ne.s32.totalorder %s1381_s23, %s1377_s22 }
   0xf   : > { %s1471_s28 = scalar_select %p28_p0, %s1385_s24, 1 }
  0x10   : > { %s31_s29 = scalar_select %p30_p1, %s1463_s26, 1 }
  0x11   : > { %p1861_p3 = scmp.eq.s32.totalorder %s1385_s24, 0  ;;  %p48_p4 = scmp.ne.s32.totalorder %s1377_s22, %s1373_s21 }
  0x12   : > { %s32_s30 = ssub.s32 %s1471_s28, %s31_s29  ;;  %p1860_p5 = scmp.eq.s32.totalorder %s1460_s25, 0 }
  0x13   : > { %p33_p6 = scmp.eq.s32.totalorder %s32_s30, 0  ;;  %p44_p7 = por %p1861_p3, %p42_p2 }
  0x14   : > { %p1482_p8 = por %p1860_p5, %p48_p4  ;;  %p1859_p9 = scmp.lt.s32.totalorder %s1385_s24, 3 }
  0x15   : > { %s1487_s7 = scalar_select %p33_p6, %s1381_s23, %s35_s27  }
  0x16   : > { %s1866_s6 = scalar_select %p1482_p8, 1, 0 }
  0x17   : > { %s1491_s8 = sand.u32 1, %s1381_s23   ;;  %s243_s9 = sand.u32 1, %s1385_s24  }
  0x18   : > { %s950_s10 = sshll.u32 %s1491_s8, 8  ;;  %p1497_p10 = pnand %p1859_p9, %p44_p7 }
  0x19   : > { %s976_s12 = sshll.u32 %s1471_s28, 12  ;;  %s1868_s1 = sld [smem:[#allocation15_spill]] }
  0x1a   : > { %s247_s16 = scalar_lea.vmem [#allocation6], %s950_s10  ;;  %s1509_s21 = scalar_lea.sflag [#allocation7], %s243_s9 }
  0x1b   : > { %s256_s17 = sshll.u32 %s247_s16, 4  ;;  %p1199_p12 = pneg %p1497_p10  ;;  %s1507_s17 = int_to_ptr.vmem [resolvable:$true] %s256_s17 }
  0x1f   : > { %s1505_s15 = scalar_lea.hbm %s1868_s1, %s976_s12  ;;  %s1202_s12 = scalar_lea.hbm %s1868_s1, 8192 }
  0x20   : > { %s1197_s27 = scalar_lea.hbm %s1505_s15, 4096  ;;  %p1203_p1 = scmp.lt.u32.totalorder %s1505_s15, %s1868_s1 }
  0x21   : > { %p1198_p11 = scmp.ne.s32.totalorder %s1505_s15, %s1197_s27  ;;  %p1204_p2 = scmp.lt.u32.totalorder %s1202_s12, %s1197_s27 }
  0x22   : > { %p1206_p6 = scmp.lt.u32.totalorder %s1197_s27, %s1505_s15 }
  0x23   : > { %p1200_p13 = pnand %p1199_p12, %p1198_p11  ;;  %p1205_p4 = por %p1204_p2, %p1203_p1 }
  0x25   : > { %p1201_p0 = pneg %p1200_p13  ;;  %p1207_p7 = por %p1206_p6, %p1205_p4 }
  0x27   : > { %p1208_p9 = pnand %p1207_p7, %p1201_p0 }
  0x29   : > { %1211 = shalt.err (!%p1208_p9)
}
  0x2a   : > { %s1212_s9 = scalar_lea.vmem %s1507_s17, 4096  ;;  %s1387_s10 = smov [#allocation6]  }
  0x2b   : > { %p1213_p11 = scmp.ne.s32.totalorder %s1507_s17, %s1212_s9  ;;  %s1217_s16 = sshll.u32 %s1387_s10, 4  ;;  %s1218_s16 = int_to_ptr.vmem [resolvable:$false] %s1217_s16 }
  0x2c   : > { %s1219_s29 = scalar_lea.vmem %s1218_s16, 8192  ;;  %p1220_p3 = scmp.lt.s32.totalorder %s1507_s17, %s1218_s16 }
  0x2d   : > { %p1215_p13 = pnand %p1213_p11, %p1199_p12  ;;  %p1221_p1 = scmp.lt.s32.totalorder %s1219_s29, %s1212_s9 }
  0x2f   : > { %p1216_p5 = pneg %p1215_p13  ;;  %p1222_p2 = por %p1221_p1, %p1220_p3 }
  0x31   : > { %p1223_p4 = pnand %p1222_p2, %p1216_p5 }
  0x33   : > { %1226 = shalt.err (!%p1223_p4)
}
  0x34   : > { %s1388_s27 = smov 128   ;;  %s1389_s30 = smov 8  }
  0x35   : > { %1124 = dma.hbm_to_vmem [thread:$0]  (!%p1497_p10), %s1505_s15, 4096, %s1507_s17, %s1509_s21, %s1388_s27, %s1388_s27, %s1389_s30  }
  0x36   : > { %p957_p9 = scmp.ge.s32.totalorder %s1385_s24, 1  ;;  %p302_p0 = scmp.lt.s32.totalorder %s1385_s24, 4 }
  0x37   : > { %s947_s12 = sshll.u32 %s1491_s8, 4  ;;  %s975_s14 = sshll.u32 %s1471_s28, 8 }
  0x38   : > { %p1540_p3 = pnand %p957_p9, %p302_p0  ;;  %s226_s9 = scalar_lea.vmem [#allocation3], %s947_s12 }
  0x39   : > { %s236_s10 = sshll.u32 %s226_s9, 4  ;;  %s1870_s0 = sld [smem:[#allocation14_spill]]  ;;  %s237_s10 = int_to_ptr.vmem [resolvable:$true] %s236_s10 }
  0x3a   : > { %s1869_s13 = scalar_select %p1540_p3, 1, 0 }
  0x3b   : > { %s223_s15 = scalar_lea.sflag [#allocation4], %s1491_s8 }
  0x3f   : > { %s1548_s1 = scalar_lea.hbm %s1870_s0, %s975_s14  ;;  %s1232_s30 = scalar_lea.hbm %s1870_s0, 512 }
  0x40   : > { %s1227_s17 = scalar_lea.hbm %s1548_s1, 256  ;;  %p1233_p11 = scmp.lt.u32.totalorder %s1548_s1, %s1870_s0 }
  0x41   : > { %p1228_p5 = scmp.ne.s32.totalorder %s1548_s1, %s1227_s17  ;;  %p1234_p13 = scmp.lt.u32.totalorder %s1232_s30, %s1227_s17 }
  0x42   : > { %p1236_p2 = scmp.lt.u32.totalorder %s1227_s17, %s1548_s1 }
  0x43   : > { %p1230_p6 = pnand %p1228_p5, %p1199_p12  ;;  %p1235_p1 = por %p1234_p13, %p1233_p11 }
  0x45   : > { %p1231_p7 = pneg %p1230_p6  ;;  %p1237_p4 = por %p1236_p2, %p1235_p1 }
  0x47   : > { %p1238_p9 = pnand %p1237_p4, %p1231_p7 }
  0x49   : > { %1241 = shalt.err (!%p1238_p9)
}
  0x4a   : > { %s1242_s8 = scalar_lea.vmem %s237_s10, 256  ;;  %s1390_s14 = smov [#allocation3]  }
  0x4b   : > { %p1243_p0 = scmp.ne.s32.totalorder %s237_s10, %s1242_s8  ;;  %s1247_s16 = sshll.u32 %s1390_s14, 4  ;;  %s1248_s16 = int_to_ptr.vmem [resolvable:$false] %s1247_s16 }
  0x4c   : > { %s1249_s29 = scalar_lea.vmem %s1248_s16, 512  ;;  %p1250_p8 = scmp.lt.s32.totalorder %s237_s10, %s1248_s16 }
  0x4d   : > { %p1245_p5 = pnand %p1243_p0, %p1199_p12  ;;  %p1251_p3 = scmp.lt.s32.totalorder %s1249_s29, %s1242_s8 }
  0x4f   : > { %p1246_p6 = pneg %p1245_p5  ;;  %p1252_p11 = por %p1251_p3, %p1250_p8 }
  0x51   : > { %p1253_p13 = pnand %p1252_p11, %p1246_p6 }
  0x53   : > { %1256 = shalt.err (!%p1253_p13)
}
  0x54   : > { %1121 = dma.hbm_to_vmem [thread:$0]  (!%p1497_p10), %s1548_s1, 256, %s237_s10, %s223_s15  }
  0x55   : > { %s938_s17 = sadd.s32 4294967294, %s1385_s24   ;;  %s940_s28 = sadd.s32 4294967294, %s1463_s26 }
  0x56   : > { %p110_p8 = scmp.gt.s32.totalorder %s938_s17, 0  ;;  %p113_p12 = scmp.gt.s32.totalorder %s940_s28, 0 }
  0x57   : > { %s118_s27 = sadd.s32 1, %s1369_s20  ;;  %p125_p3 = scmp.ne.s32.totalorder %s1369_s20, %s1365_s19 }
  0x58   : > { %s111_s11 = scalar_select %p110_p8, %s938_s17, 0 }
  0x59   : > { %s1891_s28 = smov (!%p113_p12, %s940_s28), 0  ;;  %p1871_p7 = scmp.eq.s32.totalorder %s1385_s24, 0 }
  0x5a   : > { %p131_p2 = scmp.ne.s32.totalorder %s1365_s19, %s1361_s18  ;;  %s115_s12 = ssub.s32 %s111_s11, %s1891_s28 }
  0x5b   : > { %p1577_p1 = por %p125_p3, %p1871_p7  ;;  %p193_p10 = scmp.eq.s32.totalorder %s1460_s25, 2 }
  0x5c   : > { %p116_p4 = scmp.eq.s32.totalorder %s115_s12, 0  ;;  %p1873_p9 = scmp.eq.s32.totalorder %s1460_s25, 0 }
  0x5d   : > { %p1590_p5 = por %p193_p10, %p125_p3  ;;  %p199_p6 = scmp.eq.s32.totalorder %s938_s17, 2 }
  0x5e   : > { %p1586_p0 = por %p131_p2, %p1873_p9  ;;  %s268_s8 = sand.u32 1, %s1369_s20  }
  0x5f   : > { %s1875_s10 = scalar_select %p1590_p5, 1, 0 }
  0x60   : > { %s1595_s15 = scalar_select %p116_p4, %s1369_s20, %s118_s27  }
  0x61   : > { %p1597_p11 = por %p199_p6, %p131_p2  ;;  %s953_s14 = sshll.u32 %s268_s8, 9 }
  0x62   : > { %s977_s16 = sshll.u32 %s111_s11, 9  ;;  %s270_s0 = scalar_lea.vmem [#allocation8], %s953_s14 }
  0x63   : > { %s1876_s9 = scalar_select %p1597_p11, 1, 0 }
  0x64   : > { %s1605_s12 = scalar_lea.hbm %s1856_s3, %s977_s16  ;;  %s280_s17 = sshll.u32 %s270_s0, 4  ;;  %s1615_s17 = int_to_ptr.vmem [resolvable:$true] %s280_s17 }
  0x65   : > { %p1877_p13 = scmp.lt.s32.totalorder %s1385_s24, 3  ;;  %s1257_s11 = scalar_lea.hbm %s1605_s12, 8192 }
  0x66   : > { %p1258_p12 = scmp.ne.s32.totalorder %s1605_s12, %s1257_s11  ;;  %s1262_s30 = scalar_lea.hbm %s1856_s3, 8192 }
  0x67   : > { %p1611_p8 = pnand %p1877_p13, %p1577_p1  ;;  %p1263_p1 = scmp.lt.u32.totalorder %s1605_s12, %s1856_s3 }
  0x68   : > { %p1264_p10 = scmp.lt.u32.totalorder %s1262_s30, %s1257_s11  ;;  %p1266_p9 = scmp.lt.u32.totalorder %s1257_s11, %s1605_s12 }
  0x69   : > { %p1259_p3 = pneg %p1611_p8 }
  0x6a   : > { %p1265_p4 = por %p1264_p10, %p1263_p1 }
  0x6b   : > { %p1260_p7 = pnand %p1259_p3, %p1258_p12 }
  0x6c   : > { %p1267_p6 = por %p1266_p9, %p1265_p4 }
  0x6d   : > { %p1261_p2 = pneg %p1260_p7 }
  0x6f   : > { %p1268_p13 = pnand %p1267_p6, %p1261_p2 }
  0x71   : > { %1271 = shalt.err (!%p1268_p13)
}
  0x72   : > { %s1272_s29 = scalar_lea.vmem %s1615_s17, 8192  ;;  %s1391_s28 = smov [#allocation8]  }
  0x73   : > { %p1273_p12 = scmp.ne.s32.totalorder %s1615_s17, %s1272_s29  ;;  %s1277_s8 = sshll.u32 %s1391_s28, 4  ;;  %s1278_s8 = int_to_ptr.vmem [resolvable:$false] %s1277_s8 }
  0x74   : > { %s1279_s0 = scalar_lea.vmem %s1278_s8, 16384  ;;  %p1280_p5 = scmp.lt.s32.totalorder %s1615_s17, %s1278_s8 }
  0x75   : > { %p1275_p7 = pnand %p1273_p12, %p1259_p3  ;;  %p1281_p1 = scmp.lt.s32.totalorder %s1279_s0, %s1272_s29 }
  0x77   : > { %p1276_p11 = pneg %p1275_p7  ;;  %p1282_p10 = por %p1281_p1, %p1280_p5 }
  0x79   : > { %p1283_p4 = pnand %p1282_p10, %p1276_p11 }
  0x7b   : > { %1286 = shalt.err (!%p1283_p4)
}
  0x7c   : > { %s1392_s11 = smov 512   ;;  %s1393_s30 = smov 32  }
  0x7d   : > { %1127 = dma.hbm_to_vmem [thread:$0]  (!%p1611_p8), %s1605_s12, 8192, %s1615_s17, %s1509_s21, %s1392_s11, %s1392_s11, %s1393_s30  }
  0x7e   : > { %p1879_p3 = scmp.ne.s32.totalorder %s1869_s13, 0 }
  0x7f   : > { %s308_s14 = sand.u32 (!%p1879_p3), 1, %s1377_s22   ;;  %p1880_p5 = scmp.ne.s32.totalorder (!%p1879_p3), %s1866_s6, 0 }
  0x80   : > { %306 = sbr.rel (%p1879_p3) target bundleno = 758 (0x2f6), region = 40  ;;  %s958_s16 = sshll.u32 (!%p1879_p3), %s308_s14, 4 }
  0x81   : > { %s309_s28 = scalar_lea.sflag (!%p1879_p3), [#allocation4], %s308_s14  ;;  %s1646_s29 = scalar_lea.vmem (!%p1879_p3), [#allocation3], %s958_s16 }
  0x87   : > { %1344 = dma.done.wait (%p1880_p5), %s309_s28, 256  }
  0x88   : > { %1346 = vsyncadd (%p1880_p5), %s309_s28, 4294967040  ;;  %s317_s8 = sand.u32 1, %s1460_s25   ;;  %s959_s27 = sshll.u32 %s308_s14, 8 }
  0x89   : > { %s318_s21 = scalar_lea.sflag [#allocation7], %s317_s8  ;;  %s1653_s12 = scalar_lea.vmem [#allocation6], %s959_s27 }
  0x8a   : > { %1348 = dma.done.wait (%p1880_p5), %s318_s21, 4096  }
  0x8b   : > { %1350 = vsyncadd (%p1880_p5), %s318_s21, 4294963200  ;;  %s1660_s13 = sand.u32 1, %s1365_s19  }
  0x8c   : > { %s960_s17 = sshll.u32 %s1660_s13, 9 }
  0x8d   : > { %s1663_s0 = scalar_lea.vmem [#allocation8], %s960_s17 }
  0x8e   : > { %1352 = dma.done.wait (%p1586_p0), %s318_s21, 8192  }
  0x8f   : > { %1354 = vsyncadd (%p1586_p0), %s318_s21, 4294959104  ;;  %s961_s11 = sshll.u32 %s1660_s13, 5  ;;  %s962_s30 = sadd.s32 4294967294, %s1460_s25 }
  0x90   : > { %p385_p11 = scmp.gt.s32.totalorder %s962_s30, 0  ;;  %s1680_s8 = scalar_lea.vmem [#allocation9], %s961_s11 }
  0x91   : > { %p964_p0 = scmp.ge.s32.totalorder %s1460_s25, 2 }
  0x92   : > { %s1893_s30 = smov (!%p385_p11, %s962_s30), 0  ;;  %p965_p2 = scmp.ne.s32.totalorder (!%p964_p0), %s1460_s25, 0 }
  0x93   : > { %s963_s6 = sshll.u32 %s1893_s30, 2  ;;  %402 = sbr.rel (%p964_p0) target bundleno = 479 (0x1df), region = 56 }
  0x94   : > { %p388_p8 = scmp.lt.s32.totalorder %s963_s6, 3 }
  0x96   : > { %s1895_s6 = smov (!%p388_p8, %s963_s6), 3 }
  0x97   : > { %s390_s28 = scalar_lea.vmem %s1857_s4, %s1895_s6 }
  0x9a   : > { %406 = sbr.rel (%p965_p2) target bundleno = 161 (0xa1), region = 60  ;;  %v966_v0 = vld [vmem:[%s1855_s2] ss:$0 sm:$0xff] (!%p965_p2) }
  0x9b   : > { %412 = vst [vmem:[#allocation2] sm:$0xff] (!%p965_p2), %v966_v0 }
  0xa1 PF: > { %v432_v1 = vld [vmem:[%s1653_s12 + $0x80] sm:$0xff]  ;;  %v433_v2 = vld [vmem:[%s1653_s12 + $0x88] sm:$0xff]  ;;  %v434_v6 = vld [vmem:[%s1653_s12 + $0x90] sm:$0xff]  ;;  %p967_p9 = scmp.ne.s32.totalorder %s1460_s25, 1 }
  0xa2   : > { %v416_v3 = vld [vmem:[%s1653_s12] sm:$0xff]  ;;  %v1014_v4 = vpack.c.bf16 %v433_v2, %v432_v1  ;;  %v417_v5 = vld [vmem:[%s1653_s12 + $0x8] sm:$0xff]  ;;  %v435_v7 = vld [vmem:[%s1653_s12 + $0x98] sm:$0xff] }
  0xa3   : > { %v1016_v8 = vpack.c.bf16 %v417_v5, %v416_v3  ;;  %v1018_v9 = vpack.c.bf16 %v435_v7, %v434_v6  ;;  %v418_v10 = vld [vmem:[%s1653_s12 + $0x10] sm:$0xff]  ;;  %v419_v11 = vld [vmem:[%s1653_s12 + $0x18] sm:$0xff]  ;;  %v436_v12 = vld [vmem:[%s1653_s12 + $0xa0] sm:$0xff] }
  0xa4   : > { %1015 = vmatprep.subr.bf16.mxu0 %v1014_v4  ;;  %v437_v13 = vld [vmem:[%s1653_s12 + $0xa8] sm:$0xff]  ;;  %v1020_v14 = vpack.c.bf16 %v419_v11, %v418_v10  ;;  %v420_v16 = vld [vmem:[%s1653_s12 + $0x20] sm:$0xff]  ;;  %v438_v18 = vld [vmem:[%s1653_s12 + $0xb0] sm:$0xff]  ;;  %v549_v10 = vlaneseq (!%p967_p9) }
  0xa5   : > { %1017 = vmatpush3.bf16.msra.mxu0 %v1016_v8  ;;  %v1022_v15 = vpack.c.bf16 %v437_v13, %v436_v12  ;;  %v421_v17 = vld [vmem:[%s1653_s12 + $0x28] sm:$0xff]  ;;  %v439_v19 = vld [vmem:[%s1653_s12 + $0xb8] sm:$0xff]  ;;  %v422_v22 = vld [vmem:[%s1653_s12 + $0x30] sm:$0xff] }
  0xa6   : > { %1019 = vmatprep.subr.bf16.mxu0 %v1018_v9  ;;  %v1024_v20 = vpack.c.bf16 %v421_v17, %v420_v16  ;;  %v1026_v21 = vpack.c.bf16 %v439_v19, %v438_v18  ;;  %v423_v23 = vld [vmem:[%s1653_s12 + $0x38] sm:$0xff]  ;;  %v440_v24 = vld [vmem:[%s1653_s12 + $0xc0] sm:$0xff]  ;;  %v441_v25 = vld [vmem:[%s1653_s12 + $0xc8] sm:$0xff]  ;;  %v550_v11 = vshrl.u32 (!%p967_p9), %v549_v10, 7 }
  0xa7   : > { %v415_v26 = vld [vmem:[%s1646_s29 + $0x8] sm:$0xff]  ;;  %v1028_v27 = vpack.c.bf16 %v423_v23, %v422_v22  ;;  %v1030_v28 = vpack.c.bf16 %v441_v25, %v440_v24  ;;  %v424_v29 = vld [vmem:[%s1653_s12 + $0x40] sm:$0xff]  ;;  %v442_v31 = vld [vmem:[%s1653_s12 + $0xd0] sm:$0xff] }
  0xa8   : > { %512 = vmatprep.mubr.f32.mxu0 %v415_v26  ;;  %v425_v30 = vld [vmem:[%s1653_s12 + $0x48] sm:$0xff]  ;;  %v443_v32 = vld [vmem:[%s1653_s12 + $0xd8] sm:$0xff]  ;;  %v426_v35 = vld [vmem:[%s1653_s12 + $0x50] sm:$0xff]  ;;  %v551_v13 = vsub.s32 (!%p967_p9), 0, %v550_v11 }
  0xa9   : > { %1021 = vmatpush3.bf16.msra.mxu0 %v1020_v14  ;;  %v1032_v33 = vpack.c.bf16 %v425_v30, %v424_v29  ;;  %v1034_v34 = vpack.c.bf16 %v443_v32, %v442_v31  ;;  %v427_v36 = vld [vmem:[%s1653_s12 + $0x58] sm:$0xff]  ;;  %v444_v37 = vld [vmem:[%s1653_s12 + $0xe0] sm:$0xff]  ;;  %v445_v38 = vld [vmem:[%s1653_s12 + $0xe8] sm:$0xff] }
  0xaa   : > { %1023 = vmatprep.subr.bf16.mxu0 %v1022_v15  ;;  %v1036_v39 = vpack.c.bf16 %v427_v36, %v426_v35  ;;  %v1038_v40 = vpack.c.bf16 %v445_v38, %v444_v37  ;;  %v428_v41 = vld [vmem:[%s1653_s12 + $0x60] sm:$0xff]  ;;  %v429_v42 = vld [vmem:[%s1653_s12 + $0x68] sm:$0xff]  ;;  %v446_v43 = vld [vmem:[%s1653_s12 + $0xf0] sm:$0xff] }
  0xab   : > { %v447_v44 = vld [vmem:[%s1653_s12 + $0xf8] sm:$0xff]  ;;  %v1040_v45 = vpack.c.bf16 %v429_v42, %v428_v41  ;;  %v430_v47 = vld [vmem:[%s1653_s12 + $0x70] sm:$0xff] }
  0xac   : > { %v1042_v46 = vpack.c.bf16 %v447_v44, %v446_v43  ;;  %v431_v48 = vld [vmem:[%s1653_s12 + $0x78] sm:$0xff]  ;;  %v414_v50 = vld [vmem:[%s1646_s29] sm:$0xff] }
  0xad   : > { %1025 = vmatpush3.bf16.msra.mxu0 %v1024_v20  ;;  %v1044_v49 = vpack.c.bf16 %v431_v48, %v430_v47  ;;  %v413_v52 = vld [vmem:[#allocation2] sm:$0xff] }
  0xae   : > { %1027 = vmatprep.subr.bf16.mxu0 %v1026_v21  ;;  %v542_v12 = vld [vmem:[%s1855_s2 + $0x1] sm:$0x1] (!%p967_p9)  ;;  %v546_v16 = vld [vmem:[%s1855_s2 + $0x2] sm:$0x1] (!%p967_p9) }
  0xb1   : > { %1029 = vmatpush3.bf16.msra.mxu0 %v1028_v27 }
  0xb2   : > { %1031 = vmatprep.subr.bf16.mxu0 %v1030_v28 }
  0xb5   : > { %1033 = vmatpush3.bf16.msra.mxu0 %v1032_v33 }
  0xb6   : > { %1035 = vmatprep.subr.bf16.mxu0 %v1034_v34 }
  0xb9   : > { %1037 = vmatpush3.bf16.msra.mxu0 %v1036_v39 }
  0xba   : > { %1039 = vmatprep.subr.bf16.mxu0 %v1038_v40 }
  0xbd   : > { %1041 = vmatpush3.bf16.msra.mxu0 %v1040_v45 }
  0xbe   : > { %1043 = vmatprep.subr.bf16.mxu0 %v1042_v46 }
  0xc1   : > { %1045 = vmatpush3.bf16.msra.mxu0 %v1044_v49 }
  0xc4   : > { %513 = vmatmul.mubr.f32.vlgmr.msra.gmra.mrb[0].mxu0 %v414_v50 }
 0x197   : > { %v1011_v51 = vpop.f32.mrb[0].mxu0  ;;  %523 = sbr.rel (%p967_p9) target bundleno = 479 (0x1df), region = 64 }
 0x198   : > { %v1012_v53 = vpop.f32.mrb[1].mxu0 }
 0x199   : > { %v1013_v54 = vadd.f32 %v1012_v53, %v1011_v51 }
 0x19b   : > { %v518_v55 = vadd.f32 %v1013_v54, %v413_v52 }
 0x19d   : > { %519 = vst [vmem:[#allocation2] sm:$0xff] %v518_v55 }
 0x1a4   : > { %v524_v56 = vld [vmem:[#allocation2] sm:$0xff] }
 0x1a5   : > { %v525_v57 = vrot.slane %v524_v56, 4 }
 0x1a7   : > { %v526_v58 = vadd.f32 %v525_v57, %v524_v56 }
 0x1a9   : > { %v527_v59 = vrot.slane %v526_v58, 2 }
 0x1ab   : > { %v528_v60 = vadd.f32 %v527_v59, %v526_v58 }
 0x1ad   : > { %v529_v61 = vrot.slane %v528_v60, 1 }
 0x1af   : > { %v530_v62 = vadd.f32 %v529_v61, %v528_v60 }
 0x1b1   : > { %v532_v63 = vmul.f32 0.125, %v530_v62 }
 0x1b3   : > { %v533_v0 = vsub.f32 %v524_v56, %v532_v63 }
 0x1b5   : > { %v534_v1 = vmul.f32 %v533_v0, %v533_v0 }
 0x1b7   : > { %v535_v2 = vrot.slane %v534_v1, 4 }
 0x1b9   : > { %v536_v3 = vadd.f32 %v535_v2, %v534_v1 }
 0x1bb   : > { %v537_v4 = vrot.slane %v536_v3, 2 }
 0x1bd   : > { %v538_v5 = vadd.f32 %v537_v4, %v536_v3 }
 0x1bf   : > { %v539_v6 = vrot.slane %v538_v5, 1 }
 0x1c1   : > { %v540_v7 = vadd.f32 %v539_v6, %v538_v5 }
 0x1c3   : > { %v541_v8 = vmul.f32 0.125, %v540_v7 }
 0x1c5   : > { %v543_v9 = vadd.f32 1e-05, %v541_v8 }
 0x1c7   : > { %1195 = vrsqrt.f32 %v543_v9 }
 0x1d1   : > { %v1196_v14 = vpop.eup %1195 }
 0x1d2   : > { %v545_v15 = vmul.f32 %v1196_v14, %v542_v12 }
 0x1d4   : > { %v547_v17 = vmul.f32 %v545_v15, %v532_v63  ;;  %v552_v18 = vrot.slane %v545_v15, %v551_v13 }
 0x1d6   : > { %v548_v19 = vsub.f32 %v546_v16, %v547_v17  ;;  %v553_v20 = vmul.f32 %v552_v18, %v524_v56 }
 0x1d8   : > { %v557_v21 = vrot.slane %v548_v19, %v551_v13 }
 0x1da   : > { %v558_v22 = vadd.f32 %v557_v21, %v553_v20 }
 0x1dc   : > { %v559_v23 = vmax.f32 %v558_v22, 0.0 }
 0x1de   : > { %560 = vst [vmem:[#allocation2] sm:$0xff] %v559_v23 }
 0x1df PF: > { %p968_p6 = scmp.lt.s32.totalorder %s1460_s25, 2 }
 0x1e0   : > { %v567_v24 = vld [vmem:[%s1663_s0 + $0x8] sm:$0xff] (!%p968_p6)  ;;  %v569_v26 = vld [vmem:[%s1663_s0 + $0x18] sm:$0xff] (!%p968_p6)  ;;  %v566_v29 = vld [vmem:[%s1663_s0] sm:$0xff] (!%p968_p6)  ;;  %v1394_v31 = vmov (!%p968_p6), 0.0  }
 0x1e1   : > { %564 = sbr.rel (%p968_p6) target bundleno = 733 (0x2dd), region = 68  ;;  %v571_v25 = vld [vmem:[%s1663_s0 + $0x28] sm:$0xff] (!%p968_p6)  ;;  %v573_v28 = vld [vmem:[%s1663_s0 + $0x38] sm:$0xff] (!%p968_p6)  ;;  %v570_v30 = vld [vmem:[%s1663_s0 + $0x20] sm:$0xff] (!%p968_p6)  ;;  %716 = vmatprep.mubr.f32.mxu0 (!%p968_p6), %v1394_v31  ;;  %787 = vmatprep.mubr.f32.mxu1 (!%p968_p6), %v1394_v31 }
 0x1e2   : > { %v1046_v27 = vpack.c.bf16 (!%p968_p6), %v571_v25, %v567_v24  ;;  %v1078_v32 = vpack.c.bf16 (!%p968_p6), %v573_v28, %v569_v26  ;;  %v1048_v33 = vpack.c.bf16 (!%p968_p6), %v570_v30, %v566_v29  ;;  %v568_v34 = vld [vmem:[%s1663_s0 + $0x10] sm:$0xff] (!%p968_p6)  ;;  %v575_v36 = vld [vmem:[%s1663_s0 + $0x48] sm:$0xff] (!%p968_p6)  ;;  %v577_v39 = vld [vmem:[%s1663_s0 + $0x58] sm:$0xff] (!%p968_p6) }
 0x1e3   : > { %v572_v35 = vld [vmem:[%s1663_s0 + $0x30] sm:$0xff] (!%p968_p6)  ;;  %v579_v38 = vld [vmem:[%s1663_s0 + $0x68] sm:$0xff] (!%p968_p6)  ;;  %v581_v40 = vld [vmem:[%s1663_s0 + $0x78] sm:$0xff] (!%p968_p6) }
 0x1e4   : > { %1047 = vmatprep.subr.bf16.mxu0 (!%p968_p6), %v1046_v27  ;;  %v1080_v37 = vpack.c.bf16 (!%p968_p6), %v572_v35, %v568_v34  ;;  %1079 = vmatprep.subr.bf16.mxu1 (!%p968_p6), %v1078_v32  ;;  %v1050_v41 = vpack.c.bf16 (!%p968_p6), %v579_v38, %v575_v36  ;;  %v1082_v42 = vpack.c.bf16 (!%p968_p6), %v581_v40, %v577_v39  ;;  %v574_v43 = vld [vmem:[%s1663_s0 + $0x40] sm:$0xff] (!%p968_p6)  ;;  %v576_v45 = vld [vmem:[%s1663_s0 + $0x50] sm:$0xff] (!%p968_p6)  ;;  %v583_v48 = vld [vmem:[%s1663_s0 + $0x88] sm:$0xff] (!%p968_p6) }
 0x1e5   : > { %1049 = vmatpush1.bf16.msra.mxu0 (!%p968_p6), %v1048_v33  ;;  %v578_v44 = vld [vmem:[%s1663_s0 + $0x60] sm:$0xff] (!%p968_p6)  ;;  %v580_v47 = vld [vmem:[%s1663_s0 + $0x70] sm:$0xff] (!%p968_p6)  ;;  %v587_v49 = vld [vmem:[%s1663_s0 + $0xa8] sm:$0xff] (!%p968_p6) }
 0x1e6   : > { %1081 = vmatpush1.bf16.msra.mxu1 (!%p968_p6), %v1080_v37  ;;  %v1052_v46 = vpack.c.bf16 (!%p968_p6), %v578_v44, %v574_v43  ;;  %1051 = vmatprep.subr.bf16.mxu0 (!%p968_p6), %v1050_v41  ;;  %v1084_v50 = vpack.c.bf16 (!%p968_p6), %v580_v47, %v576_v45  ;;  %v1054_v51 = vpack.c.bf16 (!%p968_p6), %v587_v49, %v583_v48  ;;  %v585_v52 = vld [vmem:[%s1663_s0 + $0x98] sm:$0xff] (!%p968_p6)  ;;  %v582_v54 = vld [vmem:[%s1663_s0 + $0x80] sm:$0xff] (!%p968_p6)  ;;  %v584_v57 = vld [vmem:[%s1663_s0 + $0x90] sm:$0xff] (!%p968_p6) }
 0x1e7   : > { %1083 = vmatprep.subr.bf16.mxu1 (!%p968_p6), %v1082_v42  ;;  %v589_v53 = vld [vmem:[%s1663_s0 + $0xb8] sm:$0xff] (!%p968_p6)  ;;  %v586_v56 = vld [vmem:[%s1663_s0 + $0xa0] sm:$0xff] (!%p968_p6)  ;;  %v588_v58 = vld [vmem:[%s1663_s0 + $0xb0] sm:$0xff] (!%p968_p6) }
 0x1e8   : > { %v1086_v55 = vpack.c.bf16 %v589_v53, %v585_v52  ;;  %v1056_v59 = vpack.c.bf16 %v586_v56, %v582_v54  ;;  %v591_v60 = vld [vmem:[%s1663_s0 + $0xc8] sm:$0xff]  ;;  %v593_v62 = vld [vmem:[%s1663_s0 + $0xd8] sm:$0xff]  ;;  %v1088_v63 = vpack.c.bf16 %v588_v58, %v584_v57  ;;  %v590_v2 = vld [vmem:[%s1663_s0 + $0xc0] sm:$0xff]  ;;  %v632_v58 = vlaneseq }
 0x1e9   : > { %1053 = vmatpush1.bf16.msra.mxu0 %v1052_v46  ;;  %v595_v61 = vld [vmem:[%s1663_s0 + $0xe8] sm:$0xff]  ;;  %v597_v1 = vld [vmem:[%s1663_s0 + $0xf8] sm:$0xff]  ;;  %v594_v3 = vld [vmem:[%s1663_s0 + $0xe0] sm:$0xff] }
 0x1ea   : > { %1085 = vmatpush1.bf16.msra.mxu1 %v1084_v50  ;;  %1055 = vmatprep.subr.bf16.mxu0 %v1054_v51  ;;  %v1058_v0 = vpack.c.bf16 %v595_v61, %v591_v60  ;;  %v1090_v4 = vpack.c.bf16 %v597_v1, %v593_v62  ;;  %v592_v5 = vld [vmem:[%s1663_s0 + $0xd0] sm:$0xff]  ;;  %v599_v7 = vld [vmem:[%s1663_s0 + $0x108] sm:$0xff]  ;;  %v601_v9 = vld [vmem:[%s1663_s0 + $0x118] sm:$0xff]  ;;  %v1060_v11 = vpack.c.bf16 %v594_v3, %v590_v2 }
 0x1eb   : > { %1087 = vmatprep.subr.bf16.mxu1 %v1086_v55  ;;  %v596_v6 = vld [vmem:[%s1663_s0 + $0xf0] sm:$0xff]  ;;  %v603_v8 = vld [vmem:[%s1663_s0 + $0x128] sm:$0xff]  ;;  %v605_v10 = vld [vmem:[%s1663_s0 + $0x138] sm:$0xff] }
 0x1ec   : > { %v1092_v12 = vpack.c.bf16 %v596_v6, %v592_v5  ;;  %v1062_v13 = vpack.c.bf16 %v603_v8, %v599_v7  ;;  %v598_v14 = vld [vmem:[%s1663_s0 + $0x100] sm:$0xff]  ;;  %v600_v16 = vld [vmem:[%s1663_s0 + $0x110] sm:$0xff]  ;;  %v1094_v17 = vpack.c.bf16 %v605_v10, %v601_v9  ;;  %v607_v19 = vld [vmem:[%s1663_s0 + $0x148] sm:$0xff] }
 0x1ed   : > { %1057 = vmatpush1.bf16.msra.mxu0 %v1056_v59  ;;  %v602_v15 = vld [vmem:[%s1663_s0 + $0x120] sm:$0xff]  ;;  %v604_v18 = vld [vmem:[%s1663_s0 + $0x130] sm:$0xff]  ;;  %v611_v20 = vld [vmem:[%s1663_s0 + $0x168] sm:$0xff]  ;;  %v633_v59 = vshrl.u32 %v632_v58, 7 }
 0x1ee   : > { %1089 = vmatpush1.bf16.msra.mxu1 %v1088_v63  ;;  %1059 = vmatprep.subr.bf16.mxu0 %v1058_v0  ;;  %v609_v21 = vld [vmem:[%s1663_s0 + $0x158] sm:$0xff]  ;;  %v1064_v23 = vpack.c.bf16 %v602_v15, %v598_v14  ;;  %v1096_v24 = vpack.c.bf16 %v604_v18, %v600_v16  ;;  %v1066_v25 = vpack.c.bf16 %v611_v20, %v607_v19  ;;  %v606_v26 = vld [vmem:[%s1663_s0 + $0x140] sm:$0xff]  ;;  %v608_v28 = vld [vmem:[%s1663_s0 + $0x150] sm:$0xff] }
 0x1ef   : > { %1091 = vmatprep.subr.bf16.mxu1 %v1090_v4  ;;  %v613_v22 = vld [vmem:[%s1663_s0 + $0x178] sm:$0xff]  ;;  %v610_v27 = vld [vmem:[%s1663_s0 + $0x160] sm:$0xff]  ;;  %v612_v30 = vld [vmem:[%s1663_s0 + $0x170] sm:$0xff]  ;;  %v634_v60 = vsub.s32 0, %v633_v59  ;;  %v642_v62 = vsub.s32 2, %v633_v59  ;;  %v638_v63 = vsub.s32 1, %v633_v59 }
 0x1f0   : > { %v1098_v29 = vpack.c.bf16 %v613_v22, %v609_v21  ;;  %v615_v31 = vld [vmem:[%s1663_s0 + $0x188] sm:$0xff]  ;;  %v617_v33 = vld [vmem:[%s1663_s0 + $0x198] sm:$0xff]  ;;  %v1068_v35 = vpack.c.bf16 %v610_v27, %v606_v26  ;;  %v1100_v36 = vpack.c.bf16 %v612_v30, %v608_v28  ;;  %v614_v38 = vld [vmem:[%s1663_s0 + $0x180] sm:$0xff]  ;;  %v646_v0 = vsub.s32 3, %v633_v59 }
 0x1f1   : > { %1061 = vmatpush1.bf16.msra.mxu0 %v1060_v11  ;;  %v619_v32 = vld [vmem:[%s1663_s0 + $0x1a8] sm:$0xff]  ;;  %v621_v34 = vld [vmem:[%s1663_s0 + $0x1b8] sm:$0xff]  ;;  %v618_v39 = vld [vmem:[%s1663_s0 + $0x1a0] sm:$0xff] }
 0x1f2   : > { %1093 = vmatpush1.bf16.msra.mxu1 %v1092_v12  ;;  %1063 = vmatprep.subr.bf16.mxu0 %v1062_v13  ;;  %v1070_v37 = vpack.c.bf16 %v619_v32, %v615_v31  ;;  %v616_v40 = vld [vmem:[%s1663_s0 + $0x190] sm:$0xff]  ;;  %v1102_v41 = vpack.c.bf16 %v621_v34, %v617_v33  ;;  %v623_v43 = vld [vmem:[%s1663_s0 + $0x1c8] sm:$0xff]  ;;  %v625_v45 = vld [vmem:[%s1663_s0 + $0x1d8] sm:$0xff]  ;;  %v1072_v47 = vpack.c.bf16 %v618_v39, %v614_v38 }
 0x1f3   : > { %1095 = vmatprep.subr.bf16.mxu1 %v1094_v17  ;;  %v620_v42 = vld [vmem:[%s1663_s0 + $0x1b0] sm:$0xff]  ;;  %v627_v44 = vld [vmem:[%s1663_s0 + $0x1e8] sm:$0xff]  ;;  %v629_v46 = vld [vmem:[%s1663_s0 + $0x1f8] sm:$0xff] }
 0x1f4   : > { %v1104_v48 = vpack.c.bf16 %v620_v42, %v616_v40  ;;  %v1074_v49 = vpack.c.bf16 %v627_v44, %v623_v43  ;;  %v622_v50 = vld [vmem:[%s1663_s0 + $0x1c0] sm:$0xff]  ;;  %v1106_v52 = vpack.c.bf16 %v629_v46, %v625_v45  ;;  %v624_v53 = vld [vmem:[%s1663_s0 + $0x1d0] sm:$0xff]  ;;  %v565_v57 = vld [vmem:[#allocation2] sm:$0xff] }
 0x1f5   : > { %1065 = vmatpush1.bf16.msra.mxu0 %v1064_v23  ;;  %v626_v51 = vld [vmem:[%s1663_s0 + $0x1e0] sm:$0xff]  ;;  %v628_v54 = vld [vmem:[%s1663_s0 + $0x1f0] sm:$0xff]  ;;  %v630_v61 = vld [vmem:[%s390_s28] sm:$0xf] }
 0x1f6   : > { %1097 = vmatpush1.bf16.msra.mxu1 %v1096_v24  ;;  %1067 = vmatprep.subr.bf16.mxu0 %v1066_v25  ;;  %v1076_v55 = vpack.c.bf16 %v626_v51, %v622_v50  ;;  %v1108_v56 = vpack.c.bf16 %v628_v54, %v624_v53  ;;  %v635_v1 = vrot.slane %v630_v61, %v634_v60 }
 0x1f7   : > { %1099 = vmatprep.subr.bf16.mxu1 %v1098_v29  ;;  %v643_v2 = vrot.slane %v630_v61, %v642_v62  ;;  %v639_v3 = vrot.slane %v630_v61, %v638_v63  ;;  %v647_v4 = vrot.slane %v630_v61, %v646_v0 }
 0x1f9   : > { %1069 = vmatpush1.bf16.msra.mxu0 %v1068_v35 }
 0x1fa   : > { %1101 = vmatpush1.bf16.msra.mxu1 %v1100_v36  ;;  %1071 = vmatprep.subr.bf16.mxu0 %v1070_v37 }
 0x1fb   : > { %1103 = vmatprep.subr.bf16.mxu1 %v1102_v41 }
 0x1fd   : > { %1073 = vmatpush1.bf16.msra.mxu0 %v1072_v47 }
 0x1fe   : > { %1105 = vmatpush1.bf16.msra.mxu1 %v1104_v48  ;;  %1075 = vmatprep.subr.bf16.mxu0 %v1074_v49 }
 0x1ff   : > { %1107 = vmatprep.subr.bf16.mxu1 %v1106_v52 }
 0x201   : > { %1077 = vmatpush1.bf16.msra.mxu0 %v1076_v55 }
 0x202   : > { %1109 = vmatpush1.bf16.msra.mxu1 %v1108_v56 }
 0x204   : > { %717 = vmatmul.mubr.f32.vlgmr.msra.gmra.mrb[0].mxu0 %v565_v57 }
 0x205   : > { %788 = vmatmul.mubr.f32.vlgmr.msra.gmra.mrb[0].mxu1 %v565_v57 }
 0x2d7   : > { %v718_v5 = vpop.f32.mrb[0].mxu0 }
 0x2d8   : > { %v719_v6 = vadd.f32 %v718_v5, %v635_v1  ;;  %v789_v7 = vpop.f32.mrb[0].mxu1  ;;  %v720_v8 = vpop.f32.mrb[1].mxu0 }
 0x2d9   : > { %v790_v9 = vadd.f32 %v789_v7, %v643_v2  ;;  %v721_v10 = vadd.f32 %v720_v8, %v639_v3  ;;  %v791_v11 = vpop.f32.mrb[1].mxu1 }
 0x2da   : > { %794 = vst [vmem:[%s1680_s8] sm:$0xff] %v719_v6  ;;  %v792_v12 = vadd.f32 %v791_v11, %v647_v4 }
 0x2db   : > { %796 = vst [vmem:[%s1680_s8 + $0x10] sm:$0xff] %v790_v9  ;;  %795 = vst [vmem:[%s1680_s8 + $0x8] sm:$0xff] %v721_v10 }
 0x2dc   : > { %797 = vst [vmem:[%s1680_s8 + $0x18] sm:$0xff] %v792_v12 }
 0x2dd PF: > { %s978_s0 = sshll.u32 %s1893_s30, 9  ;;  %s816_s28 = sshll.u32 %s1680_s8, 4  ;;  %s817_s28 = int_to_ptr.vmem [resolvable:$true] %s816_s28 }
 0x2de   : > { %s1806_s16 = scalar_lea.hbm %s1858_s5, %s978_s0  ;;  %s799_s1 = scalar_lea.sflag [#allocation5], %s1660_s13 }
 0x2df   : > { %s1287_s27 = scalar_lea.vmem %s817_s28, 512  ;;  %p1881_p12 = scmp.ne.s32.totalorder %s1875_s10, 0 }
 0x2e0   : > { %p1288_p13 = scmp.ne.s32.totalorder %s817_s28, %s1287_s27  ;;  %s1395_s29 = smov [#allocation9]  }
 0x2e1   : > { %s1291_s21 = sshll.u32 %s1395_s29, 4  ;;  %s1292_s21 = int_to_ptr.vmem [resolvable:$false] %s1291_s21 }
 0x2e2   : > { %p1289_p7 = pnand %p1288_p13, %p1881_p12  ;;  %s1293_s12 = scalar_lea.vmem %s1292_s21, 1024 }
 0x2e3   : > { %p1294_p10 = scmp.lt.s32.totalorder %s817_s28, %s1292_s21  ;;  %p1295_p4 = scmp.lt.s32.totalorder %s1293_s12, %s1287_s27 }
 0x2e4   : > { %p1290_p1 = pneg %p1289_p7 }
 0x2e5   : > { %p1296_p3 = por %p1295_p4, %p1294_p10 }
 0x2e7   : > { %p1297_p5 = pnand %p1296_p3, %p1290_p1 }
 0x2e9   : > { %1300 = shalt.err (!%p1297_p5)
}
 0x2ea   : > { %s1301_s13 = scalar_lea.hbm %s1806_s16, 512  ;;  %s1305_s17 = scalar_lea.hbm %s1858_s5, 512 }
 0x2eb   : > { %p1302_p11 = scmp.ne.s32.totalorder %s1806_s16, %s1301_s13  ;;  %p1306_p2 = scmp.lt.u32.totalorder %s1806_s16, %s1858_s5 }
 0x2ec   : > { %p1307_p9 = scmp.lt.u32.totalorder %s1305_s17, %s1301_s13  ;;  %p1309_p13 = scmp.lt.u32.totalorder %s1301_s13, %s1806_s16 }
 0x2ed   : > { %p1303_p8 = pnand %p1302_p11, %p1881_p12 }
 0x2ee   : > { %p1308_p6 = por %p1307_p9, %p1306_p2 }
 0x2ef   : > { %p1304_p0 = pneg %p1303_p8 }
 0x2f0   : > { %p1310_p7 = por %p1309_p13, %p1308_p6 }
 0x2f2   : > { %p1311_p1 = pnand %p1310_p7, %p1304_p0 }
 0x2f4   : > { %1314 = shalt.err (!%p1311_p1)
}
 0x2f5   : > { %1116 = dma.vmem_to_hbm [thread:$0]  (%p1881_p12), %s817_s28, 512, %s1806_s16, %s799_s1  }
 0x2f6 PF: > { %p1133_p10 = scmp.ge.s32.totalorder %s1385_s24, 2  ;;  %s828_s0 = sand.u32 1, %s1361_s18  }
 0x2f7   : > { %p1882_p4 = scmp.ne.s32.totalorder %s1876_s9, 0  ;;  %s829_s6 = scalar_lea.sflag [#allocation5], %s828_s0 }
 0x2f9   : > { %p1129_p3 = pnand %p1133_p10, %p1882_p4 }
 0x2fb   : > { %1356 = dma.done.wait (!%p1129_p3), %s829_s6, 512  }
 0x2fc   : > { %1358 = vsyncadd (!%p1129_p3), %s829_s6, 4294966784  ;;  %p21_p12 = scmp.ge.s32.totalorder %s1463_s26, 5   ;;  %s1883_s18 = smov %s1365_s19 }
 0x2fd   : > { %s1884_s19 = smov %s1369_s20  ;;  %s1885_s20 = smov %s1595_s15 }
 0x2fe   : > { %s1886_s21 = smov %s1377_s22  ;;  %s1887_s22 = smov %s1381_s23 }
 0x2ff   : > { %s1888_s23 = smov %s1487_s7  ;;  %s1889_s24 = smov %s1463_s26 }
 0x300   :  { %23 = sbr.rel (!%p21_p12) target bundleno = 12 (0xc), region = 128 }
 0x307   :  { %834 = vsyncpa [#allocation4], 1 }
 0x308   :  { %836 = vsyncpa [#allocation4 + $0x1], 1 }
 0x309   :  { %837 = vsyncpa [#allocation7], 1 }
 0x30a   :  { %839 = vsyncpa [#allocation7 + $0x1], 1 }
 0x30b   :  { %840 = vsyncpa [#allocation5], 1 }
 0x30c   :  { %842 = vsyncpa [#allocation5 + $0x1], 1 }

</bundles_post_ra>
